<compile_context>
chip_gen: v7x
topology: tpu7x:2x2x1
jax: 0.10.0
libtpu: 0.0.40
codegen_flags: <defaults>
</compile_context>

<pallas_src>
import functools

import jax
import jax.numpy as jnp
from jax.experimental import pallas as pl
from jax.experimental.pallas import tpu as pltpu

EMBEDDING_DIM = 128   # matches the module-level `embedding_dim = 128`
_MiB = 1024 * 1024


def _tpu_config():
    """Per-generation block size and VMEM budgets."""
    kind = ""
    try:
        kind = jax.devices()[0].device_kind.lower()
    except Exception:
        pass
    if "v7" in kind:
        # 64 MiB VMEM per TensorCore -> keep resident budget well below it.
        return dict(block_rows=128, vmem_limit=48 * _MiB,
                    resident_budget=40 * _MiB, resident_max_nodes=32768,
                    stream_max_bytes=48 * _MiB)
    if "v6" in kind:
        # 128 MiB VMEM, 256x256 MXU -> bigger blocks, bigger resident tables.
        return dict(block_rows=256, vmem_limit=100 * _MiB,
                    resident_budget=80 * _MiB, resident_max_nodes=65536,
                    stream_max_bytes=48 * _MiB)
    if "v5 lite" in kind or "v5e" in kind:
        # 4x128x128 MXU, slower f32 -> lower one-hot crossover, 128-row blocks.
        return dict(block_rows=128, vmem_limit=96 * _MiB,
                    resident_budget=64 * _MiB, resident_max_nodes=16384,
                    stream_max_bytes=16 * _MiB)
    # Unknown generation: conservative (v7x-like) defaults.
    return dict(block_rows=128, vmem_limit=48 * _MiB,
                resident_budget=40 * _MiB, resident_max_nodes=16384,
                stream_max_bytes=32 * _MiB)


# ---------------------------------------------------------------------------
# Path A: table resident in VMEM, gather via one-hot matmul on the MXU.
#         Column-iota is built once (grid step 0) into a VMEM scratch.
# ---------------------------------------------------------------------------
def _resident_gather_kernel(ids_ref, table_ref, out_ref, iota_ref):
    # ids_ref:   (B, 1) int32 block of node ids
    # table_ref: (num_nodes, D) full embedding table, resident in VMEM
    # out_ref:   (B, D) output block
    # iota_ref:  (B, num_nodes) int32 scratch, grid-invariant column indices
    @pl.when(pl.program_id(0) == 0)
    def _():
        iota_ref[...] = jax.lax.broadcasted_iota(jnp.int32, iota_ref.shape, 1)

    onehot = (iota_ref[...] == ids_ref[...]).astype(table_ref.dtype)
    out_ref[...] = jnp.dot(
        onehot, table_ref[...], preferred_element_type=jnp.float32
    ).astype(out_ref.dtype)


def _gather_resident(ids_pad, table, block_rows, vmem_limit):
    n_pad = ids_pad.shape[0]
    num_nodes, d = table.shape
    ids_2d = ids_pad.reshape(n_pad, 1)
    return pl.pallas_call(
        _resident_gather_kernel,
        out_shape=jax.ShapeDtypeStruct((n_pad, d), table.dtype),
        grid=(n_pad // block_rows,),
        in_specs=[
            pl.BlockSpec((block_rows, 1), lambda i: (i, 0)),
            # Constant block index -> table is fetched from HBM only once.
            pl.BlockSpec((num_nodes, d), lambda i: (0, 0)),
        ],
        out_specs=pl.BlockSpec((block_rows, d), lambda i: (i, 0)),
        scratch_shapes=[pltpu.VMEM((block_rows, num_nodes), jnp.int32)],
        compiler_params=pltpu.CompilerParams(
            # The cached iota carries across grid steps -> sequential grid.
            dimension_semantics=("arbitrary",),
            vmem_limit_bytes=vmem_limit,
        ),
    )(ids_2d, table)


# ---------------------------------------------------------------------------
# Path B: table streamed from HBM as (TK, D) tiles over a K grid axis and
#         accumulated with a one-hot MXU matmul (init/finalize via pl.when).
# ---------------------------------------------------------------------------
def _streamed_gather_kernel(ids_ref, table_ref, out_ref, acc_ref, *, tile_k):
    # ids_ref:   (B, 1) int32 (same block for every k)
    # table_ref: (tile_k, D) table tile
    # out_ref:   (B, D) output block (same block for every k)
    # acc_ref:   (B, D) f32 accumulator scratch
    k = pl.program_id(1)

    @pl.when(k == 0)
    def _():
        acc_ref[...] = jnp.zeros_like(acc_ref)

    ids = ids_ref[...]
    cols = k * tile_k + jax.lax.broadcasted_iota(
        jnp.int32, (ids.shape[0], tile_k), 1)
    onehot = (cols == ids).astype(table_ref.dtype)
    acc_ref[...] += jnp.dot(onehot, table_ref[...],
                            preferred_element_type=jnp.float32)

    @pl.when(k == pl.num_programs(1) - 1)
    def _():
        out_ref[...] = acc_ref[...].astype(out_ref.dtype)


def _gather_streamed(ids_pad, table, block_rows, tile_k=512):
    n_pad = ids_pad.shape[0]
    num_nodes, d = table.shape
    k_pad = pl.cdiv(num_nodes, tile_k) * tile_k
    if k_pad != num_nodes:
        # Zero-pad so every table tile is full; padded rows are never selected
        # (ids clamped to [0, num_nodes-1]) and zeros keep the accum clean.
        table = jnp.pad(table, ((0, k_pad - num_nodes), (0, 0)))
    ids_2d = ids_pad.reshape(n_pad, 1)
    kernel = functools.partial(_streamed_gather_kernel, tile_k=tile_k)
    return pl.pallas_call(
        kernel,
        out_shape=jax.ShapeDtypeStruct((n_pad, d), table.dtype),
        grid=(n_pad // block_rows, k_pad // tile_k),
        in_specs=[
            pl.BlockSpec((block_rows, 1), lambda i, k: (i, 0)),
            pl.BlockSpec((tile_k, d), lambda i, k: (k, 0)),
        ],
        out_specs=pl.BlockSpec((block_rows, d), lambda i, k: (i, 0)),
        scratch_shapes=[pltpu.VMEM((block_rows, d), jnp.float32)],
        compiler_params=pltpu.CompilerParams(
            dimension_semantics=("parallel", "arbitrary"),
        ),
    )(ids_2d, table)


# ---------------------------------------------------------------------------
# Path C: table in HBM, per-row DMA gather with cross-step double buffering.
#         One DMA semaphore per buffer slot; block i+1's DMAs are issued
#         before waiting on block i's slot.
# ---------------------------------------------------------------------------
def _make_rowdma_kernel(block_rows):
    def kernel(ids_ref, table_hbm, out_ref, stage_ref, sem_ref):
        # ids_ref:   (n_pad,) int32 in SMEM (scalar prefetch)
        # table_hbm: (num_nodes, D) raw HBM ref (memory_space=pl.ANY)
        # out_ref:   (block_rows, D) output block in VMEM
        # stage_ref: (2, block_rows, D) VMEM double buffer
        # sem_ref:   (2,) DMA semaphores, one per slot
        i = pl.program_id(0)
        n_blocks = pl.num_programs(0)
        slot = i & 1

        def issue_block(block_idx, buf_slot):
            base = block_idx * block_rows

            def start_one(j, carry):
                idx = ids_ref[base + j]
                pltpu.make_async_copy(
                    table_hbm.at[pl.ds(idx, 1), :],
                    stage_ref.at[buf_slot, pl.ds(j, 1), :],
                    sem_ref.at[buf_slot],
                ).start()
                return carry

            jax.lax.fori_loop(0, block_rows, start_one, 0, unroll=8)

        # Prime: issue block 0's row DMAs on the very first grid step.
        @pl.when(i == 0)
        def _():
            issue_block(0, 0)

        # Prefetch block i+1 into the other slot while block i's (already
        # in-flight) DMAs complete -> cross-step double buffering.
        @pl.when(i + 1 < n_blocks)
        def _():
            issue_block(i + 1, 1 - slot)

        # Wait for all of block i's row copies.  Descriptors match the ones
        # issued (same src/dst/sem); each wait retires one row's worth.
        base = i * block_rows

        def wait_one(j, carry):
            idx = ids_ref[base + j]
            pltpu.make_async_copy(
                table_hbm.at[pl.ds(idx, 1), :],
                stage_ref.at[slot, pl.ds(j, 1), :],
                sem_ref.at[slot],
            ).wait()
            return carry

        jax.lax.fori_loop(0, block_rows, wait_one, 0, unroll=8)

        # Single dense (block_rows, D) store; HBM writeback is pipelined.
        out_ref[...] = stage_ref[slot]

    return kernel


def _gather_rowdma(ids_pad, table, block_rows):
    n_pad = ids_pad.shape[0]
    num_nodes, d = table.shape
    return pl.pallas_call(
        _make_rowdma_kernel(block_rows),
        out_shape=jax.ShapeDtypeStruct((n_pad, d), table.dtype),
        grid_spec=pltpu.PrefetchScalarGridSpec(
            num_scalar_prefetch=1,                         # ids -> SMEM
            grid=(n_pad // block_rows,),
            in_specs=[pl.BlockSpec(memory_space=pl.ANY)],  # table stays in HBM
            out_specs=pl.BlockSpec((block_rows, d), lambda i, ids: (i, 0)),
            scratch_shapes=[
                pltpu.VMEM((2, block_rows, d), table.dtype),
                pltpu.SemaphoreType.DMA((2,)),
            ],
        ),
        compiler_params=pltpu.CompilerParams(
            # DMA state (double buffer + sems) carries across grid steps.
            dimension_semantics=("arbitrary",),
        ),
    )(ids_pad, table)


# ---------------------------------------------------------------------------
# Wrapper = Node2VecModel.forward
# ---------------------------------------------------------------------------
def node2vec_forward(nodes, embedding_table, *, block_rows=None, force_path=None):
    """Equivalent of Node2VecModel.forward: out[...] = embedding_table[nodes]."""
    cfg = _tpu_config()
    if block_rows is None:
        block_rows = cfg["block_rows"]

    num_nodes, d = embedding_table.shape
    table_bytes = num_nodes * d * embedding_table.dtype.itemsize

    # Clamp ids so a bad index can never drive an out-of-bounds DMA
    # (nn.Embedding would raise; for valid inputs the result is identical).
    flat_ids = jnp.clip(nodes.reshape(-1).astype(jnp.int32), 0, num_nodes - 1)
    n = flat_ids.shape[0]
    n_pad = pl.cdiv(n, block_rows) * block_rows
    ids_pad = jnp.pad(flat_ids, (0, n_pad - n))   # pad rows gather row 0, sliced off

    # Estimated VMEM need for the resident path: table (assume double-buffered)
    # + cached iota scratch + one-hot intermediate + pipelined in/out blocks.
    resident_est = (2 * table_bytes
                    + 2 * block_rows * num_nodes * 4
                    + 4 * block_rows * d * 4)

    if force_path is None:
        if (num_nodes <= cfg["resident_max_nodes"]
                and resident_est <= cfg["resident_budget"]):
            path = "resident"
        elif table_bytes <= cfg["stream_max_bytes"]:
            path = "stream"
        else:
            path = "rowdma"
    else:
        path = force_path
    assert path in ("resident", "stream", "rowdma"), path

    if path == "resident":
        out_flat = _gather_resident(ids_pad, embedding_table, block_rows,
                                    cfg["vmem_limit"])
    elif path == "stream":
        out_flat = _gather_streamed(ids_pad, embedding_table, block_rows)
    else:
        out_flat = _gather_rowdma(ids_pad, embedding_table, block_rows)

    return out_flat[:n].reshape(nodes.shape + (d,))


if __name__ == "__main__":
    key = jax.random.PRNGKey(0)
    k1, k2, k3, k4 = jax.random.split(key, 4)

    # --- Small test matching the module defaults: num_nodes=64, nodes (2, 8).
    num_nodes = 64
    table = jax.random.normal(k1, (num_nodes, EMBEDDING_DIM), dtype=jnp.float32)
    nodes = jax.random.randint(k2, (2, 8), 0, num_nodes, dtype=jnp.int32)
    ref = jnp.take(table, nodes, axis=0)

    out = jax.block_until_ready(node2vec_forward(nodes, table))
    assert out.shape == (2, 8, EMBEDDING_DIM), out.shape
    assert out.dtype == jnp.float32
    assert jnp.allclose(out, ref), "auto (resident) path mismatch"

    # --- Larger test exercising all three paths: multiple output blocks and
    #     (for the streamed path) multiple K tiles with a ragged table size.
    num_nodes2 = 1100
    table2 = jax.random.normal(k3, (num_nodes2, EMBEDDING_DIM), dtype=jnp.float32)
    nodes2 = jax.random.randint(k4, (4, 96), 0, num_nodes2, dtype=jnp.int32)
    ref2 = jnp.take(table2, nodes2, axis=0)

    for path in ("resident", "stream", "rowdma"):
        out2 = jax.block_until_ready(
            node2vec_forward(nodes2, table2, force_path=path))
        assert out2.shape == (4, 96, EMBEDDING_DIM), (path, out2.shape)
        assert jnp.allclose(out2, ref2), f"{path} path mismatch"

    print("KERNEL_OK")
</pallas_src>

<mosaic_0001>
module attributes {stable_mosaic.version = 11 : i64} {
  func.func @_resident_gather_kernel(%arg0: i32, %arg1: memref<128x1xi32, #tpu.memory_space<vmem>>, %arg2: memref<64x128xf32, #tpu.memory_space<vmem>>, %arg3: memref<128x128xf32, #tpu.memory_space<vmem>>, %arg4: memref<128x64xi32, #tpu.memory_space<vmem>>) attributes {dimension_semantics = [#tpu.dimension_semantics<arbitrary>], iteration_bounds = array<i64: 1>, scalar_prefetch = 0 : i64, scratch_operands = 1 : i64, tpu.core_type = #tpu.core_type<tc>, window_params = [{transform_indices = @transform_0, window_bounds = array<i64: 128, 1>}, {pipeline_mode = #tpu.pipeline_mode<synchronous>, transform_indices = @transform_1, window_bounds = array<i64: 64, 128>}, {transform_indices = @transform_2, window_bounds = array<i64: 128, 128>}]} {
    %c0_i32 = arith.constant 0 : i32
    %0 = arith.cmpi eq, %arg0, %c0_i32 : i32
    %1 = arith.extui %0 : i1 to i32
    %c0_i32_0 = arith.constant 0 : i32
    %2 = arith.cmpi ne, %1, %c0_i32_0 : i32
    scf.if %2 {
      %12 = tpu.iota {dimensions = array<i32: 1>} : vector<128x64xi32>
      %c0_8 = arith.constant 0 : index
      %c0_9 = arith.constant 0 : index
      %13 = vector.load %arg4[%c0_8, %c0_9] : memref<128x64xi32, #tpu.memory_space<vmem>>, vector<128x64xi32>
      tpu.vector_store %arg4[%c0_8, %c0_9], %12 {strides = array<i32>} : memref<128x64xi32, #tpu.memory_space<vmem>>, vector<128x64xi32>,
    } else {
    }
    %c0 = arith.constant 0 : index
    %c0_1 = arith.constant 0 : index
    %3 = vector.load %arg4[%c0, %c0_1] : memref<128x64xi32, #tpu.memory_space<vmem>>, vector<128x64xi32>
    %c0_2 = arith.constant 0 : index
    %c0_3 = arith.constant 0 : index
    %4 = vector.load %arg1[%c0_2, %c0_3] : memref<128x1xi32, #tpu.memory_space<vmem>>, vector<128x1xi32>
    %5 = vector.broadcast %4 : vector<128x1xi32> to vector<128x64xi32>
    %6 = arith.cmpi eq, %3, %5 : vector<128x64xi32>
    %7 = arith.extui %6 : vector<128x64xi1> to vector<128x64xi32>
    %8 = arith.sitofp %7 : vector<128x64xi32> to vector<128x64xf32>
    %c0_4 = arith.constant 0 : index
    %c0_5 = arith.constant 0 : index
    %9 = vector.load %arg2[%c0_4, %c0_5] : memref<64x128xf32, #tpu.memory_space<vmem>>, vector<64x128xf32>
    %cst = arith.constant dense<0.000000e+00> : vector<128x128xf32>
    %10 = tpu.matmul %8, %9, %cst {dimension_numbers = #tpu.dot_dimension_numbers<[1], [0], [0], [1], [0, 0, 1, 1], [], []>} : vector<128x64xf32>, vector<64x128xf32>, vector<128x128xf32> -> vector<128x128xf32>
    %c0_6 = arith.constant 0 : index
    %c0_7 = arith.constant 0 : index
    %11 = vector.load %arg3[%c0_6, %c0_7] : memref<128x128xf32, #tpu.memory_space<vmem>>, vector<128x128xf32>
    tpu.vector_store %arg3[%c0_6, %c0_7], %10 {strides = array<i32>} : memref<128x128xf32, #tpu.memory_space<vmem>>, vector<128x128xf32>,
    return
  }
  func.func @transform_0(%arg0: i32) -> (i32, i32) {
    %c0_i32 = arith.constant 0 : i32
    %c0_i32_0 = arith.constant 0 : i32
    return %arg0, %c0_i32 : i32, i32
  }
  func.func @transform_1(%arg0: i32) -> (i32, i32) {
    %c0_i32 = arith.constant 0 : i32
    %c0_i32_0 = arith.constant 0 : i32
    %c0_i32_1 = arith.constant 0 : i32
    return %c0_i32, %c0_i32_0 : i32, i32
  }
  func.func @transform_2(%arg0: i32) -> (i32, i32) {
    %c0_i32 = arith.constant 0 : i32
    %c0_i32_0 = arith.constant 0 : i32
    return %arg0, %c0_i32 : i32, i32
  }
}

</mosaic_0001>

<bundles_post_ra>
// kernel: tpu_custom_call.1
= control target key start
LH: loop header
LB: loop body
LE: loop exit
PB: predicated region body
PF: predicated region fallthrough
CT: control target
= control target key end

     0   :  { %v16_v2 = vlaneseq  ;;  %v548_v3 = vmov 0   ;;  %vm18_vm0 = vcmask 523264   ;;  %s700_s0 = inlined_call_operand.vmem [shape: s32[128,1], index: 0, kind: input, shape index: {}]   ;;  %s701_s1 = inlined_call_operand.vmem [shape: f32[64,128], index: 1, kind: input, shape index: {}]   ;;  %s702_s2 = inlined_call_operand.hbm [shape: f32[128,128], index: 2, kind: output, shape index: {}]  }
   0x1   :  { %v52_v0 = vld [vmem:[%s700_s0 + $0x8] sm:$0xff]  ;;  %v51_v1 = vld [vmem:[%s700_s0] sm:$0xff]  ;;  %523 = vset.pattern.permute.xlu1 %v548_v3  ;;  %522 = vset.pattern.permute.xlu0 %v548_v3  ;;  %v165_v10 = vld [vmem:[%s701_s1 + $0x10] sm:$0xff] }
   0x2   :  { %71 = vperm.xlu1 %523, %v52_v0   ;;  %68 = vperm.xlu0 %522, %v51_v1   ;;  %v17_v4 = vand.u32 127, %v16_v2  ;;  %v60_v5 = vld [vmem:[%s700_s0 + $0x48] sm:$0xff]  ;;  %v59_v6 = vld [vmem:[%s700_s0 + $0x40] sm:$0xff]  ;;  %v166_v11 = vld [vmem:[%s701_s1 + $0x18] sm:$0xff] }
   0x3   :  { %v163_v7 = vld [vmem:[%s701_s1] sm:$0xff]  ;;  %v164_v8 = vld [vmem:[%s701_s1 + $0x8] sm:$0xff]  ;;  %v61_v12 = vld [vmem:[%s700_s0 + $0x50] sm:$0xff]  ;;  %v497_v14 = vpack.c.bf16 %v166_v11, %v165_v10 }
   0x4   :  { %20 = vst.msk [vmem:[#allocation2 + $0x8] sm:$0xff] %vm18_vm0, %v17_v4  ;;  %19 = vst.msk [vmem:[#allocation2] sm:$0xff] %vm18_vm0, %v17_v4  ;;  %v493_v9 = vpack.c.bf16 %v164_v8, %v163_v7  ;;  %v53_v13 = vld [vmem:[%s700_s0 + $0x10] sm:$0xff]  ;;  %v167_v15 = vld [vmem:[%s701_s1 + $0x20] sm:$0xff] }
   0x5   :  { %21 = vst.msk [vmem:[#allocation2 + $0x10] sm:$0xff] %vm18_vm0, %v17_v4  ;;  %22 = vst.msk [vmem:[#allocation2 + $0x18] sm:$0xff] %vm18_vm0, %v17_v4  ;;  %v168_v16 = vld [vmem:[%s701_s1 + $0x28] sm:$0xff] }
   0x6   :  { %23 = vst.msk [vmem:[#allocation2 + $0x20] sm:$0xff] %vm18_vm0, %v17_v4  ;;  %24 = vst.msk [vmem:[#allocation2 + $0x28] sm:$0xff] %vm18_vm0, %v17_v4  ;;  %95 = vperm.xlu1 %523, %v60_v5   ;;  %92 = vperm.xlu0 %522, %v59_v6  }
   0x7   :  { %25 = vst.msk [vmem:[#allocation2 + $0x30] sm:$0xff] %vm18_vm0, %v17_v4  ;;  %26 = vst.msk [vmem:[#allocation2 + $0x38] sm:$0xff] %vm18_vm0, %v17_v4  ;;  %494 = vmatprep.subr.bf16.mxu0 %v493_v9  ;;  %509 = vmatprep.subr.bf16.mxu1 %v493_v9 }
   0x8   :  { %27 = vst.msk [vmem:[#allocation2 + $0x40] sm:$0xff] %vm18_vm0, %v17_v4  ;;  %28 = vst.msk [vmem:[#allocation2 + $0x48] sm:$0xff] %vm18_vm0, %v17_v4 }
   0x9   :  { %29 = vst.msk [vmem:[#allocation2 + $0x50] sm:$0xff] %vm18_vm0, %v17_v4  ;;  %30 = vst.msk [vmem:[#allocation2 + $0x58] sm:$0xff] %vm18_vm0, %v17_v4 }
   0xa   :  { %31 = vst.msk [vmem:[#allocation2 + $0x60] sm:$0xff] %vm18_vm0, %v17_v4  ;;  %32 = vst.msk [vmem:[#allocation2 + $0x68] sm:$0xff] %vm18_vm0, %v17_v4 }
   0xb   :  { %33 = vst.msk [vmem:[#allocation2 + $0x70] sm:$0xff] %vm18_vm0, %v17_v4  ;;  %34 = vst.msk [vmem:[#allocation2 + $0x78] sm:$0xff] %vm18_vm0, %v17_v4 }
   0xc   :  { %7 = vsyncpa [#allocation4], 0  ;;  %496 = vmatpush3.bf16.msra.mxu0 %v493_v9  ;;  %513 = vmatpush3.bf16.msra.mxu1 %v493_v9  ;;  %v62_v17 = vld [vmem:[%s700_s0 + $0x58] sm:$0xff]  ;;  %v501_v19 = vpack.c.bf16 %v168_v16, %v167_v15  ;;  %v169_v20 = vld [vmem:[%s701_s1 + $0x30] sm:$0xff]  ;;  %v549_v35 = vmov 0.0  }
   0xd   :  { %98 = vperm.xlu1 %523, %v61_v12   ;;  %74 = vperm.xlu0 %522, %v53_v13   ;;  %v54_v18 = vld [vmem:[%s700_s0 + $0x18] sm:$0xff]  ;;  %v63_v22 = vld [vmem:[%s700_s0 + $0x60] sm:$0xff]  ;;  %v64_v25 = vld [vmem:[%s700_s0 + $0x68] sm:$0xff] }
   0xe   :  { %498 = vmatprep.subr.bf16.mxu0 %v497_v14  ;;  %510 = vmatprep.subr.bf16.mxu1 %v497_v14  ;;  %v170_v21 = vld [vmem:[%s701_s1 + $0x38] sm:$0xff]  ;;  %v55_v23 = vld [vmem:[%s700_s0 + $0x20] sm:$0xff]  ;;  %v56_v26 = vld [vmem:[%s700_s0 + $0x28] sm:$0xff] }
   0xf   :  { %v505_v24 = vpack.c.bf16 %v170_v21, %v169_v20  ;;  %v65_v27 = vld [vmem:[%s700_s0 + $0x70] sm:$0xff]  ;;  %v66_v29 = vld [vmem:[%s700_s0 + $0x78] sm:$0xff]  ;;  %v36_v31 = vld [vmem:[#allocation2 + $0x8] sm:$0xff] }
  0x10   :  { %500 = vmatpush3.bf16.msra.mxu0 %v497_v14  ;;  %514 = vmatpush3.bf16.msra.mxu1 %v497_v14  ;;  %v57_v28 = vld [vmem:[%s700_s0 + $0x30] sm:$0xff]  ;;  %v58_v30 = vld [vmem:[%s700_s0 + $0x38] sm:$0xff]  ;;  %v35_v32 = vld [vmem:[#allocation2] sm:$0xff]  ;;  %s550_s0 = smov [#allocation3]  }
  0x11   :  { %101 = vperm.xlu1 %523, %v62_v17   ;;  %77 = vperm.xlu0 %522, %v54_v18   ;;  %v44_v38 = vld [vmem:[#allocation2 + $0x48] sm:$0xff]  ;;  %v43_v39 = vld [vmem:[#allocation2 + $0x40] sm:$0xff]  ;;  %v45_v44 = vld [vmem:[#allocation2 + $0x50] sm:$0xff]  ;;  %s386_s28 = sshll.u32 %s550_s0, 4  ;;  %s387_s28 = int_to_ptr.vmem [resolvable:$true] %s386_s28 }
  0x12   :  { %502 = vmatprep.subr.bf16.mxu0 %v501_v19  ;;  %511 = vmatprep.subr.bf16.mxu1 %v501_v19  ;;  %v37_v45 = vld [vmem:[#allocation2 + $0x10] sm:$0xff]  ;;  %v46_v50 = vld [vmem:[#allocation2 + $0x58] sm:$0xff]  ;;  %v47_v56 = vld [vmem:[#allocation2 + $0x60] sm:$0xff]  ;;  %s524_s29 = scalar_lea.vmem %s387_s28, 2048  ;;  %p529_p1 = scmp.lt.s32.totalorder %s387_s28, %s387_s28 }
  0x13   :  { %v38_v51 = vld [vmem:[#allocation2 + $0x18] sm:$0xff]  ;;  %v39_v57 = vld [vmem:[#allocation2 + $0x20] sm:$0xff]  ;;  %v48_v62 = vld [vmem:[#allocation2 + $0x68] sm:$0xff]  ;;  %p525_p0 = scmp.ne.s32.totalorder %s387_s28, %s524_s29  ;;  %p530_p2 = scmp.lt.s32.totalorder %s524_s29, %s524_s29 }
  0x14   :  { %504 = vmatpush3.bf16.msra.mxu0 %v501_v19  ;;  %515 = vmatpush3.bf16.msra.mxu1 %v501_v19  ;;  %v40_v63 = vld [vmem:[#allocation2 + $0x28] sm:$0xff]  ;;  %v49_v4 = vld [vmem:[#allocation2 + $0x70] sm:$0xff]  ;;  %v50_v10 = vld [vmem:[#allocation2 + $0x78] sm:$0xff] }
  0x15   :  { %104 = vperm.xlu1 %523, %v63_v22   ;;  %80 = vperm.xlu0 %522, %v55_v23   ;;  %v41_v5 = vld [vmem:[#allocation2 + $0x30] sm:$0xff]  ;;  %v42_v11 = vld [vmem:[#allocation2 + $0x38] sm:$0xff]  ;;  %p531_p3 = por %p530_p2, %p529_p1 }
  0x16   :  { %506 = vmatprep.subr.bf16.mxu0 %v505_v24  ;;  %512 = vmatprep.subr.bf16.mxu1 %v505_v24 }
  0x17   :  { %p532_p4 = pnand %p531_p3, %p525_p0 }
  0x18   :  { %508 = vmatpush3.bf16.msra.mxu0 %v505_v24  ;;  %516 = vmatpush3.bf16.msra.mxu1 %v505_v24 }
  0x19   :  { %107 = vperm.xlu1 %523, %v64_v25   ;;  %83 = vperm.xlu0 %522, %v56_v26  }
  0x1d   :  { %110 = vperm.xlu1 %523, %v65_v27   ;;  %86 = vperm.xlu0 %522, %v57_v28  }
  0x21   :  { %113 = vperm.xlu1 %523, %v66_v29   ;;  %89 = vperm.xlu0 %522, %v58_v30  }
  0x81   :  { %v72_v33 = vpop.permute.xlu1 %71  ;;  %v69_v34 = vpop.permute.xlu0 %68 }
  0x82   :  { %vm116_vm1 = vcmp.eq.s32.totalorder %v36_v31, %v72_v33  ;;  %vm115_vm2 = vcmp.eq.s32.totalorder %v35_v32, %v69_v34 }
  0x83   :  { %v398_v36 = vsel %vm116_vm1, 1.0, %v549_v35  ;;  %v397_v37 = vsel %vm115_vm2, 1.0, %v549_v35 }
  0x84   :  { %469 = vmatprep.mubr.msk.f32.mxu0 %vm18_vm0, %v397_v37 }
  0x85   :  { %v96_v40 = vpop.permute.xlu1 %95  ;;  %v93_v41 = vpop.permute.xlu0 %92  ;;  %470 = vmatmul.mubr.msk.f32.vlgmr.msra.gmra.mrb[0].mxu0 %vm18_vm0, %v398_v36 }
  0x86   :  { %vm124_vm3 = vcmp.eq.s32.totalorder %v44_v38, %v96_v40  ;;  %vm123_vm4 = vcmp.eq.s32.totalorder %v43_v39, %v93_v41 }
  0x87   :  { %v406_v42 = vsel %vm124_vm3, 1.0, %v549_v35  ;;  %v405_v43 = vsel %vm123_vm4, 1.0, %v549_v35 }
  0x88   :  { %481 = vmatprep.mubr.msk.f32.mxu1 %vm18_vm0, %v405_v43 }
  0x89   :  { %482 = vmatmul.mubr.msk.f32.vlgmr.msra.gmra.mrb[0].mxu1 %vm18_vm0, %v406_v42 }
  0x8c   :  { %v99_v46 = vpop.permute.xlu1 %98  ;;  %v75_v47 = vpop.permute.xlu0 %74 }
  0x8d   :  { %vm125_vm5 = vcmp.eq.s32.totalorder %v45_v44, %v99_v46  ;;  %vm117_vm6 = vcmp.eq.s32.totalorder %v37_v45, %v75_v47 }
  0x8e   :  { %v407_v48 = vsel %vm125_vm5, 1.0, %v549_v35  ;;  %v399_v49 = vsel %vm117_vm6, 1.0, %v549_v35 }
  0x8f   :  { %472 = vmatprep.mubr.msk.f32.mxu0 %vm18_vm0, %v399_v49  ;;  %484 = vmatprep.mubr.msk.f32.mxu1 %vm18_vm0, %v407_v48 }
  0x90   :  { %v102_v52 = vpop.permute.xlu1 %101  ;;  %v78_v53 = vpop.permute.xlu0 %77 }
  0x91   :  { %vm126_vm7 = vcmp.eq.s32.totalorder %v46_v50, %v102_v52  ;;  %vm118_vm8 = vcmp.eq.s32.totalorder %v38_v51, %v78_v53 }
  0x92   :  { %v408_v54 = vsel %vm126_vm7, 1.0, %v549_v35  ;;  %v400_v55 = vsel %vm118_vm8, 1.0, %v549_v35 }
  0x93   :  { %473 = vmatmul.mubr.msk.f32.gmra.mrb[2].mxu0 %vm18_vm0, %v400_v55  ;;  %485 = vmatmul.mubr.msk.f32.gmra.mrb[2].mxu1 %vm18_vm0, %v408_v54 }
  0x94   :  { %v105_v58 = vpop.permute.xlu1 %104  ;;  %v81_v59 = vpop.permute.xlu0 %80 }
  0x95   :  { %vm127_vm9 = vcmp.eq.s32.totalorder %v47_v56, %v105_v58  ;;  %vm119_vm10 = vcmp.eq.s32.totalorder %v39_v57, %v81_v59 }
  0x96   :  { %v409_v60 = vsel %vm127_vm9, 1.0, %v549_v35  ;;  %v401_v61 = vsel %vm119_vm10, 1.0, %v549_v35 }
  0x97   :  { %475 = vmatprep.mubr.msk.f32.mxu0 %vm18_vm0, %v401_v61  ;;  %487 = vmatprep.mubr.msk.f32.mxu1 %vm18_vm0, %v409_v60 }
  0x98   :  { %v108_v0 = vpop.permute.xlu1 %107  ;;  %v84_v1 = vpop.permute.xlu0 %83 }
  0x99   :  { %vm128_vm11 = vcmp.eq.s32.totalorder %v48_v62, %v108_v0  ;;  %vm120_vm12 = vcmp.eq.s32.totalorder %v40_v63, %v84_v1 }
  0x9a   :  { %v410_v2 = vsel %vm128_vm11, 1.0, %v549_v35  ;;  %v402_v3 = vsel %vm120_vm12, 1.0, %v549_v35 }
  0x9b   :  { %476 = vmatmul.mubr.msk.f32.gmra.mrb[4].mxu0 %vm18_vm0, %v402_v3  ;;  %488 = vmatmul.mubr.msk.f32.gmra.mrb[4].mxu1 %vm18_vm0, %v410_v2 }
  0x9c   :  { %v111_v6 = vpop.permute.xlu1 %110  ;;  %v87_v7 = vpop.permute.xlu0 %86 }
  0x9d   :  { %vm129_vm13 = vcmp.eq.s32.totalorder %v49_v4, %v111_v6  ;;  %vm121_vm14 = vcmp.eq.s32.totalorder %v41_v5, %v87_v7 }
  0x9e   :  { %v411_v8 = vsel %vm129_vm13, 1.0, %v549_v35  ;;  %v403_v9 = vsel %vm121_vm14, 1.0, %v549_v35 }
  0x9f   :  { %478 = vmatprep.mubr.msk.f32.mxu0 %vm18_vm0, %v403_v9  ;;  %490 = vmatprep.mubr.msk.f32.mxu1 %vm18_vm0, %v411_v8 }
  0xa0   :  { %v114_v12 = vpop.permute.xlu1 %113  ;;  %v90_v13 = vpop.permute.xlu0 %89 }
  0xa1   :  { %vm130_vm15 = vcmp.eq.s32.totalorder %v50_v10, %v114_v12  ;;  %vm122_vm1 = vcmp.eq.s32.totalorder %v42_v11, %v90_v13 }
  0xa2   :  { %v412_v14 = vsel %vm130_vm15, 1.0, %v549_v35  ;;  %v404_v15 = vsel %vm122_vm1, 1.0, %v549_v35 }
  0xa3   :  { %479 = vmatmul.mubr.msk.f32.gmra.mrb[6].mxu0 %vm18_vm0, %v404_v15  ;;  %491 = vmatmul.mubr.msk.f32.gmra.mrb[6].mxu1 %vm18_vm0, %v412_v14 }
 0x158   :  { %v471_v16 = vpop.f32.mrb[0].mxu0 }
 0x159   :  { %366 = vst [vmem:[#allocation3 + $0x8] sm:$0xff] %v471_v16  ;;  %v286_v17 = vpop.f32.mrb[1].mxu0 }
 0x15a   :  { %365 = vst [vmem:[#allocation3] sm:$0xff] %v286_v17 }
 0x15c   :  { %v483_v18 = vpop.f32.mrb[0].mxu1 }
 0x15d   :  { %374 = vst [vmem:[#allocation3 + $0x48] sm:$0xff] %v483_v18  ;;  %v326_v19 = vpop.f32.mrb[1].mxu1 }
 0x15e   :  { %373 = vst [vmem:[#allocation3 + $0x40] sm:$0xff] %v326_v19 }
 0x166   :  { %v474_v20 = vpop.f32.mrb[2].mxu0  ;;  %v486_v21 = vpop.f32.mrb[2].mxu1 }
 0x167   :  { %368 = vst [vmem:[#allocation3 + $0x18] sm:$0xff] %v474_v20  ;;  %376 = vst [vmem:[#allocation3 + $0x58] sm:$0xff] %v486_v21  ;;  %v296_v22 = vpop.f32.mrb[3].mxu0  ;;  %v336_v23 = vpop.f32.mrb[3].mxu1 }
 0x168   :  { %367 = vst [vmem:[#allocation3 + $0x10] sm:$0xff] %v296_v22  ;;  %375 = vst [vmem:[#allocation3 + $0x50] sm:$0xff] %v336_v23 }
 0x16e   :  { %v477_v24 = vpop.f32.mrb[4].mxu0  ;;  %v489_v25 = vpop.f32.mrb[4].mxu1 }
 0x16f   :  { %370 = vst [vmem:[#allocation3 + $0x28] sm:$0xff] %v477_v24  ;;  %378 = vst [vmem:[#allocation3 + $0x68] sm:$0xff] %v489_v25  ;;  %v306_v26 = vpop.f32.mrb[5].mxu0  ;;  %v346_v27 = vpop.f32.mrb[5].mxu1 }
 0x170   :  { %369 = vst [vmem:[#allocation3 + $0x20] sm:$0xff] %v306_v26  ;;  %377 = vst [vmem:[#allocation3 + $0x60] sm:$0xff] %v346_v27 }
 0x176   :  { %v480_v28 = vpop.f32.mrb[6].mxu0  ;;  %v492_v29 = vpop.f32.mrb[6].mxu1 }
 0x177   :  { %372 = vst [vmem:[#allocation3 + $0x38] sm:$0xff] %v480_v28  ;;  %380 = vst [vmem:[#allocation3 + $0x78] sm:$0xff] %v492_v29  ;;  %v316_v30 = vpop.f32.mrb[7].mxu0  ;;  %v356_v31 = vpop.f32.mrb[7].mxu1 }
 0x178   :  { %371 = vst [vmem:[#allocation3 + $0x30] sm:$0xff] %v316_v30  ;;  %379 = vst [vmem:[#allocation3 + $0x70] sm:$0xff] %v356_v31 }
 0x179   :  { %535 = shalt.err (!%p532_p4)
}
 0x17a   :  { %s536_s4 = scalar_lea.hbm %s702_s2, 2048 }
 0x17b   :  { %p537_p5 = scmp.ne.s32.totalorder %s702_s2, %s536_s4  ;;  %p540_p6 = scmp.lt.u32.totalorder %s536_s4, %s702_s2 }
 0x17d   :  { %p542_p7 = pnand %p540_p6, %p537_p5 }
 0x17f   :  { %545 = shalt.err (!%p542_p7)
}
 0x180   :  { %s551_s9 = smov 128   ;;  %s552_s10 = smov 8  }
 0x181   :  { %392 = dma.vmem_to_hbm [thread:$0]  %s387_s28, 2048, %s702_s2, [#allocation4], %s551_s9, %s551_s9, %s552_s10  }
 0x182   :  { %546 = dma.done.wait [#allocation4], 2048  }
 0x183   :  { %547 = vsyncadd [#allocation4], 4294965248 }
 0x184   :  { %396 = vsyncpa [#allocation4], 1 }

</bundles_post_ra>
